<compile_context>
chip_gen: v5e
topology: v5e:2x2
jax: 0.10.0
libtpu: 0.0.40
codegen_flags: <defaults>
</compile_context>

<pallas_src>
import jax
import jax.numpy as jnp
from jax.experimental import pallas as pl
from jax.experimental.pallas import tpu as pltpu


def _phase_kernel(cs_ref, x_ref, o_ref):
    # cs_ref: (2, 1, TL)   [0] = cos(phases), [1] = sin(phases)  (resident)
    # x_ref : (2, TB, TL)  [0] = real plane,  [1] = imag plane   (streamed)
    # o_ref : (2, TB, TL)
    c = cs_ref[0]                      # (1, TL) -> broadcasts over rows
    s = cs_ref[1]
    xr = x_ref[0]                      # (TB, TL)
    xi = x_ref[1]
    # (xr + i*xi) * (c + i*s)
    o_ref[0] = xr * c - xi * s
    o_ref[1] = xr * s + xi * c


def _fold_factor(b, n):
    """Smallest r >= 1 with b % r == 0 and (r*n) % 128 == 0, or 0 if none exists."""
    if n % 128 == 0:
        return 1
    for r in range(2, 129):
        if b % r == 0 and (r * n) % 128 == 0:
            return r
    return 0


def _pick_tiles(G, L, block_bytes=4 * 1024 * 1024):
    """(TB, TL): ~4 MiB f32 (2, TB, TL) blocks; TB multiple of 8 (or full extent)."""
    TL = min(L, 64 * 1024)                        # lane tile (mult of 128); normally = L
    if G <= 8:
        return G, TL                              # full-extent rows (always legal)
    target_rows = max(8, block_bytes // (2 * TL * 4))
    TB = min(G, target_rows)
    if G >= 16:
        TB = min(TB, G // 2)                      # >= 2 grid steps -> v7x 2-TC split
    TB = max(8, (TB // 8) * 8)
    return TB, TL


def phase_transforms_apply_planes(x_planes: jax.Array, cos_sin: jax.Array) -> jax.Array:
    """Core Pallas op on plane-packed data (no complex<->plane repack).

    x_planes: (2, G, L) f32  -- [0]=Re, [1]=Im, L % 128 == 0
    cos_sin : (2, 1, L) f32  -- [0]=cos(phases), [1]=sin(phases), tiled to L
    returns : (2, G, L) f32
    """
    two, G, L = x_planes.shape
    assert two == 2 and L % 128 == 0 and cos_sin.shape == (2, 1, L)
    TB, TL = _pick_tiles(G, L)
    grid = (pl.cdiv(L, TL), pl.cdiv(G, TB))       # lane axis outer -> cos_sin resident
    return pl.pallas_call(
        _phase_kernel,
        out_shape=jax.ShapeDtypeStruct((2, G, L), jnp.float32),
        grid=grid,
        in_specs=[
            pl.BlockSpec((2, 1, TL), lambda j, i: (0, 0, j)),    # cos/sin: resident
            pl.BlockSpec((2, TB, TL), lambda j, i: (0, i, j)),   # x planes: streamed
        ],
        out_specs=pl.BlockSpec((2, TB, TL), lambda j, i: (0, i, j)),
        compiler_params=pltpu.CompilerParams(
            dimension_semantics=("parallel", "parallel"),        # megacore / 2-TC split
            vmem_limit_bytes=32 * 1024 * 1024,                   # ~17 MiB steady state
        ),
    )(cos_sin, x_planes)


def phase_transforms_forward(x: jax.Array, phases: jax.Array) -> jax.Array:
    """Complex-in / complex-out wrapper matching torch: x @ diag(exp(1j*phases)).T.

    The complex <-> plane-packed conversion happens exactly once here; callers
    that apply the layer repeatedly should use `phase_transforms_apply_planes`
    and keep activations plane-packed (zero repack traffic).
    Supports arbitrary leading batch dims (last dim must equal ndim).
    """
    n = phases.shape[0]
    orig_shape = x.shape
    assert orig_shape[-1] == n
    x2 = jnp.asarray(x, jnp.complex64).reshape(-1, n)
    b = x2.shape[0]
    ph = phases.astype(jnp.float32)

    r = _fold_factor(b, n)
    if r == 0:
        # No lane-dense fold exists: pad the feature dim up to a multiple of 128
        # so every vreg is full and stores are unmasked; padding is sliced off.
        n_eff = ((n + 127) // 128) * 128
        x2 = jnp.pad(x2, ((0, 0), (0, n_eff - n)))
        ph = jnp.pad(ph, (0, n_eff - n))
        r = 1
    else:
        n_eff = n

    G, L = b // r, r * n_eff

    # One-time complex -> plane-packed conversion (layer-boundary cost only).
    # TODO(synk): would be a free bitcast if lax.bitcast_convert_type supported complex.
    x_planes = jnp.stack(
        [jnp.real(x2).astype(jnp.float32).reshape(G, L),
         jnp.imag(x2).astype(jnp.float32).reshape(G, L)],
        axis=0)                                              # (2, G, L)
    ph_tiled = jnp.tile(ph, r)                               # (L,)
    cos_sin = jnp.stack([jnp.cos(ph_tiled), jnp.sin(ph_tiled)],
                        axis=0).reshape(2, 1, L)             # tiny, computed once

    out_planes = phase_transforms_apply_planes(x_planes, cos_sin)

    out = jax.lax.complex(out_planes[0].reshape(b, n_eff),
                          out_planes[1].reshape(b, n_eff))
    if n_eff != n:
        out = out[:, :n]
    return out.reshape(orig_shape)


def reference_forward(x: jax.Array, phases: jax.Array) -> jax.Array:
    # Pure-JAX reference mirroring torch: x @ diag(exp(1j*phases)).T
    mat = jnp.diag(jnp.exp(1j * phases.astype(jnp.complex64))).T
    return jnp.matmul(jnp.asarray(x, jnp.complex64), mat,
                      precision=jax.lax.Precision.HIGHEST)


if __name__ == "__main__":
    key = jax.random.PRNGKey(0)
    k_ph, k_xr, k_xi, k_ph2, k_yr, k_yi = jax.random.split(key, 6)

    # Case 1: (batch, ndim) = (8, 32) -- lane-dense batch-fold path (r=4 -> L=128)
    batch, ndim = 8, 32
    phases = jax.random.normal(k_ph, (ndim,), dtype=jnp.float32)
    x = jax.lax.complex(
        jax.random.normal(k_xr, (batch, ndim), dtype=jnp.float32),
        jax.random.normal(k_xi, (batch, ndim), dtype=jnp.float32),
    )
    out = jax.block_until_ready(phase_transforms_forward(x, phases))
    ref = reference_forward(x, phases)
    assert out.shape == ref.shape and out.dtype == jnp.complex64
    assert float(jnp.max(jnp.abs(out - ref))) < 1e-5

    # Case 2: (3, 20) -- exercises the lane-pad fallback (20 -> 128 lanes)
    phases2 = jax.random.normal(k_ph2, (20,), dtype=jnp.float32)
    y = jax.lax.complex(
        jax.random.normal(k_yr, (3, 20), dtype=jnp.float32),
        jax.random.normal(k_yi, (3, 20), dtype=jnp.float32),
    )
    out2 = jax.block_until_ready(phase_transforms_forward(y, phases2))
    ref2 = reference_forward(y, phases2)
    assert out2.shape == ref2.shape and out2.dtype == jnp.complex64
    assert float(jnp.max(jnp.abs(out2 - ref2))) < 1e-5

    print("KERNEL_OK")
</pallas_src>

<mosaic_0001>
module attributes {stable_mosaic.version = 11 : i64} {
  func.func @_phase_kernel(%arg0: i32, %arg1: i32, %arg2: memref<2x1x128xf32, #tpu.memory_space<vmem>>, %arg3: memref<2x2x128xf32, #tpu.memory_space<vmem>>, %arg4: memref<2x2x128xf32, #tpu.memory_space<vmem>>) attributes {dimension_semantics = [#tpu.dimension_semantics<parallel>, #tpu.dimension_semantics<parallel>], iteration_bounds = array<i64: 1, 1>, scalar_prefetch = 0 : i64, scratch_operands = 0 : i64, tpu.core_type = #tpu.core_type<tc>, window_params = [{transform_indices = @transform_0, window_bounds = array<i64: 2, 1, 128>}, {transform_indices = @transform_1, window_bounds = array<i64: 2, 2, 128>}, {transform_indices = @transform_2, window_bounds = array<i64: 2, 2, 128>}]} {
    %c0 = arith.constant 0 : index
    %c0_0 = arith.constant 0 : index
    %c0_1 = arith.constant 0 : index
    %0 = vector.load %arg2[%c0, %c0_0, %c0_1] : memref<2x1x128xf32, #tpu.memory_space<vmem>>, vector<1x1x128xf32>
    %1 = vector.shape_cast %0 : vector<1x1x128xf32> to vector<1x128xf32>
    %c1 = arith.constant 1 : index
    %c0_2 = arith.constant 0 : index
    %c0_3 = arith.constant 0 : index
    %2 = vector.load %arg2[%c1, %c0_2, %c0_3] : memref<2x1x128xf32, #tpu.memory_space<vmem>>, vector<1x1x128xf32>
    %3 = vector.shape_cast %2 : vector<1x1x128xf32> to vector<1x128xf32>
    %c0_4 = arith.constant 0 : index
    %c0_5 = arith.constant 0 : index
    %c0_6 = arith.constant 0 : index
    %4 = vector.load %arg3[%c0_4, %c0_5, %c0_6] : memref<2x2x128xf32, #tpu.memory_space<vmem>>, vector<1x2x128xf32>
    %5 = vector.shape_cast %4 : vector<1x2x128xf32> to vector<2x128xf32>
    %c1_7 = arith.constant 1 : index
    %c0_8 = arith.constant 0 : index
    %c0_9 = arith.constant 0 : index
    %6 = vector.load %arg3[%c1_7, %c0_8, %c0_9] : memref<2x2x128xf32, #tpu.memory_space<vmem>>, vector<1x2x128xf32>
    %7 = vector.shape_cast %6 : vector<1x2x128xf32> to vector<2x128xf32>
    %8 = vector.broadcast %1 : vector<1x128xf32> to vector<2x128xf32>
    %9 = arith.mulf %5, %8 : vector<2x128xf32>
    %10 = vector.broadcast %3 : vector<1x128xf32> to vector<2x128xf32>
    %11 = arith.mulf %7, %10 : vector<2x128xf32>
    %12 = arith.subf %9, %11 : vector<2x128xf32>
    %c0_10 = arith.constant 0 : index
    %c0_11 = arith.constant 0 : index
    %c0_12 = arith.constant 0 : index
    %13 = vector.load %arg4[%c0_10, %c0_11, %c0_12] : memref<2x2x128xf32, #tpu.memory_space<vmem>>, vector<1x2x128xf32>
    %14 = vector.shape_cast %13 : vector<1x2x128xf32> to vector<2x128xf32>
    %15 = vector.shape_cast %12 : vector<2x128xf32> to vector<1x2x128xf32>
    tpu.vector_store %arg4[%c0_10, %c0_11, %c0_12], %15 {strides = array<i32>} : memref<2x2x128xf32, #tpu.memory_space<vmem>>, vector<1x2x128xf32>,
    %16 = vector.broadcast %3 : vector<1x128xf32> to vector<2x128xf32>
    %17 = arith.mulf %5, %16 : vector<2x128xf32>
    %18 = vector.broadcast %1 : vector<1x128xf32> to vector<2x128xf32>
    %19 = arith.mulf %7, %18 : vector<2x128xf32>
    %20 = arith.addf %17, %19 : vector<2x128xf32>
    %c1_13 = arith.constant 1 : index
    %c0_14 = arith.constant 0 : index
    %c0_15 = arith.constant 0 : index
    %21 = vector.load %arg4[%c1_13, %c0_14, %c0_15] : memref<2x2x128xf32, #tpu.memory_space<vmem>>, vector<1x2x128xf32>
    %22 = vector.shape_cast %21 : vector<1x2x128xf32> to vector<2x128xf32>
    %23 = vector.shape_cast %20 : vector<2x128xf32> to vector<1x2x128xf32>
    tpu.vector_store %arg4[%c1_13, %c0_14, %c0_15], %23 {strides = array<i32>} : memref<2x2x128xf32, #tpu.memory_space<vmem>>, vector<1x2x128xf32>,
    return
  }
  func.func @transform_0(%arg0: i32, %arg1: i32) -> (i32, i32, i32) {
    %c0_i32 = arith.constant 0 : i32
    %c0_i32_0 = arith.constant 0 : i32
    %c0_i32_1 = arith.constant 0 : i32
    return %c0_i32, %c0_i32_0, %arg0 : i32, i32, i32
  }
  func.func @transform_1(%arg0: i32, %arg1: i32) -> (i32, i32, i32) {
    %c0_i32 = arith.constant 0 : i32
    %c0_i32_0 = arith.constant 0 : i32
    return %c0_i32, %arg1, %arg0 : i32, i32, i32
  }
  func.func @transform_2(%arg0: i32, %arg1: i32) -> (i32, i32, i32) {
    %c0_i32 = arith.constant 0 : i32
    %c0_i32_0 = arith.constant 0 : i32
    return %c0_i32, %arg1, %arg0 : i32, i32, i32
  }
}

</mosaic_0001>

<bundles_post_ra>
// kernel: tpu_custom_call.1
= control target key start
LH: loop header
LB: loop body
LE: loop exit
PB: predicated region body
PF: predicated region fallthrough
CT: control target
= control target key end

     0   :  { %7 = vsyncpa [#allocation3], 0  ;;  %s203_s0 = inlined_call_operand.hbm [shape: f32[2,1,128], index: 0, kind: input, shape index: {}]   ;;  %s204_s1 = inlined_call_operand.hbm [shape: f32[2,2,128], index: 1, kind: input, shape index: {}]   ;;  %s205_s2 = inlined_call_operand.hbm [shape: f32[2,2,128], index: 2, kind: output, shape index: {}]  }
   0x1   :  { %8 = vsyncpa [#allocation6], 0 }
   0x2   :  { %9 = vsyncpa [#allocation4], 0  ;;  %s14_s11 = sshll.u32 %s203_s0, 4  ;;  %s172_s12 = smov [#allocation2]   ;;  %s15_s11 = int_to_ptr.hbm [resolvable:$true] %s14_s11 }
   0x3   :  { %s16_s13 = sshll.u32 %s172_s12, 4  ;;  %s27_s16 = sshll.u32 %s204_s1, 4  ;;  %s17_s13 = int_to_ptr.vmem [resolvable:$true] %s16_s13  ;;  %s28_s16 = int_to_ptr.hbm [resolvable:$true] %s27_s16 }
   0x4   :  { %s173_s17 = smov 16   ;;  %s174_s18 = smov 1  }
   0x5   :  { %22 = dma.hbm_to_vmem [thread:$0]  %s15_s11, 32, %s17_s13, [#allocation3], %s173_s17, %s173_s17, %s174_s18  }
   0x6   :  { %s175_s19 = smov [#allocation5]   ;;  %s176_s21 = smov 32  }
   0x7   :  { %s29_s20 = sshll.u32 %s175_s19, 4  ;;  %s177_s22 = smov 2   ;;  %s30_s20 = int_to_ptr.vmem [resolvable:$true] %s29_s20 }
   0x8   :  { %35 = dma.hbm_to_vmem [thread:$0]  %s28_s16, 64, %s30_s20, [#allocation6], %s176_s21, %s176_s21, %s177_s22  }
   0x9   :  { %166 = dma.done.wait [#allocation3], 32  }
   0xa   :  { %167 = vsyncadd [#allocation3], 4294967264 }
   0xb   :  { %168 = dma.done.wait [#allocation6], 64  }
   0xc   :  { %169 = vsyncadd [#allocation6], 4294967232  ;;  %v47_v0 = vld [vmem:[#allocation5] sm:$0x3]  ;;  %v49_v1 = vld [vmem:[#allocation5 + $0x2] sm:$0x3] }
   0xd   :  { %v92_v2 = vld [vmem:[#allocation2] ss:$0 sm:$0xff]  ;;  %v93_v3 = vld [vmem:[#allocation2 + $0x1] ss:$0 sm:$0xff]  ;;  %s178_s0 = smov [#allocation7]   ;;  %s71_s25 = sshll.u32 %s205_s2, 4  ;;  %s72_s25 = int_to_ptr.hbm [resolvable:$true] %s71_s25 }
   0xe   :  { %v53_v4 = vmul.f32 %v92_v2, %v47_v0  ;;  %v57_v5 = vmul.f32 %v93_v3, %v49_v1  ;;  %v60_v6 = vmul.f32 %v93_v3, %v47_v0  ;;  %v61_v7 = vmul.f32 %v92_v2, %v49_v1  ;;  %s69_s1 = sshll.u32 %s178_s0, 4  ;;  %s70_s1 = int_to_ptr.vmem [resolvable:$true] %s69_s1 }
  0x10   :  { %v58_v8 = vsub.f32 %v53_v4, %v57_v5  ;;  %v62_v9 = vadd.f32 %v61_v7, %v60_v6 }
  0x12   :  { %59 = vst [vmem:[#allocation7] sm:$0x3] %v58_v8 }
  0x13   :  { %64 = vst [vmem:[#allocation7 + $0x2] sm:$0x3] %v62_v9 }
  0x14   :  { %77 = dma.vmem_to_hbm [thread:$0]  %s70_s1, 64, %s72_s25, [#allocation4], %s176_s21, %s176_s21, %s177_s22  }
  0x15   :  { %170 = dma.done.wait [#allocation4], 64  }
  0x16   :  { %171 = vsyncadd [#allocation4], 4294967232 }
  0x17   :  { %82 = vsyncpa [#allocation3], 1 }
  0x18   :  { %83 = vsyncpa [#allocation6], 1 }
  0x19   :  { %84 = vsyncpa [#allocation4], 1 }

</bundles_post_ra>
